<compile_context>
chip_gen: v7x
topology: tpu7x:2x2x1
jax: 0.10.0
libtpu: 0.0.40
codegen_flags: <defaults>
</compile_context>

<pallas_src>
import functools

import jax
import jax.numpy as jnp
import numpy as np
from jax.experimental import pallas as pl
from jax.experimental.pallas import tpu as pltpu

LANE = 128  # lane width of the packed weight slab and of the padded output head


def graph_network_kernel(
    x_ref,        # [N, Fin]        node features (compute dtype)
    a_wide_ref,   # [N, R*N]        [A_1 | ... | A_R]  mean-normalized per-relation adjacency
    x_bd_ref,     # [R*N, R*Fin]    blockdiag(x, ..., x)
    a2_ref,       # [N, N]          sum adjacency for GraphConv
    slab_ref,     # [rows, 128]     all weights/biases packed along sublanes
    out_ref,      # [N, 128]        lane-dense log-prob output (valid cols = :out_feats)
    *, layout):
    f32 = jnp.float32
    cdt = x_ref.dtype  # MXU operand dtype: float32 or bfloat16 (accumulation always f32)

    def blk(name):
        off, r, c = layout[name]          # static python ints -> static ref slice
        return slab_ref[off:off + r, :c]

    def bias(name):
        return blk(name).astype(f32)

    x = x_ref[...]

    # ---- RGCNConv: per-relation loop folded into two wide MXU matmuls ----
    # msg_all[:, r*Fin:(r+1)*Fin] == A_r @ x   (X_bd is the block-diagonal replication of x)
    msg_all = jnp.dot(a_wide_ref[...], x_bd_ref[...], preferred_element_type=f32)
    h1 = (jnp.dot(x, blk("w_root1"), preferred_element_type=f32)
          + jnp.dot(msg_all.astype(cdt), blk("w_rel_stack"), preferred_element_type=f32)
          + bias("b1"))                                                     # [N, H]
    h1c = h1.astype(cdt)

    # ---- GraphConv: lin_rel(sum_j h1_j) + bias + lin_root(h1) ----
    agg = jnp.dot(a2_ref[...], h1c, preferred_element_type=f32)             # [N, H]
    h2 = (jnp.dot(agg.astype(cdt), blk("w_rel2"), preferred_element_type=f32)
          + bias("b_rel2")
          + jnp.dot(h1c, blk("w_root2"), preferred_element_type=f32))       # [N, H]
    h2c = h2.astype(cdt)

    # ---- classify_node_features (h_cat = [x | h2] kept split -> stays lane-aligned) ----
    before_x = (jnp.dot(x, blk("wb_xx"), preferred_element_type=f32)
                + jnp.dot(h2c, blk("wb_hx"), preferred_element_type=f32)
                + bias("bb_x"))                                             # [N, Fin]
    before_h = (jnp.dot(x, blk("wb_xh"), preferred_element_type=f32)
                + jnp.dot(h2c, blk("wb_hh"), preferred_element_type=f32)
                + bias("bb_h"))                                             # [N, H]

    # late = before @ h_cat.T  (contract the feature axis of both split halves)
    late = (jax.lax.dot_general(before_x.astype(cdt), x, (((1,), (1,)), ((), ())),
                                preferred_element_type=f32)
            + jax.lax.dot_general(before_h.astype(cdt), h2c, (((1,), (1,)), ((), ())),
                                  preferred_element_type=f32))              # [N, N]
    beta = jax.nn.softmax(late, axis=-1).astype(cdt)   # F.softmax default dim=1 for 2-D input

    em_x = jnp.dot(beta, x, preferred_element_type=f32)                     # [N, Fin]
    em_h = jnp.dot(beta, h2c, preferred_element_type=f32)                   # [N, H]

    hidden = jax.nn.relu(jnp.dot(em_x.astype(cdt), blk("wl_x"), preferred_element_type=f32)
                         + jnp.dot(em_h.astype(cdt), blk("wl_h"), preferred_element_type=f32)
                         + bias("b_lin"))                                   # [N, H]
    # TODO(synk): nn.Dropout is identity at inference; stochastic dropout not applied.

    # Lane-dense classifier head: w_smax zero-padded to 128 lanes, b_smax padded with -1e30 so the
    # padded logits contribute exp(...) == 0 to the log_softmax; caller slices [:, :out_feats].
    logits = (jnp.dot(hidden.astype(cdt), blk("w_smax"), preferred_element_type=f32)
              + bias("b_smax"))                                             # [N, 128]
    out_ref[...] = jax.nn.log_softmax(logits, axis=-1)


def _full_spec(shape):
    nd = len(shape)
    return pl.BlockSpec(shape, lambda *_: (0,) * nd)


def _pack_weight_slab(named_blocks, lane_width=LANE):
    """Stack 2-D weight/bias blocks along the sublane axis into one lane-dense slab.

    Every block is zero-padded to `lane_width` lanes and its row count rounded up to a multiple
    of 8 so each block starts at an 8-aligned sublane offset; the kernel recovers the block with
    a static ref slice.  Returns (slab[f32], layout) with layout[name] = (row_offset, rows, cols).
    """
    layout = {}
    parts = []
    off = 0
    for name, arr in named_blocks:
        arr = jnp.asarray(arr, jnp.float32)
        r, c = arr.shape
        r_pad = ((r + 7) // 8) * 8
        buf = jnp.zeros((r_pad, lane_width), jnp.float32).at[:r, :c].set(arr)
        parts.append(buf)
        layout[name] = (off, r, c)
        off += r_pad
    return jnp.concatenate(parts, axis=0), layout


def build_dense_adjacency(edge_index, edge_type, num_nodes, n_relations):
    """Dense adjacency glue (plain JAX): messages flow source -> target."""
    src, dst = edge_index[0], edge_index[1]
    # RGCN: per-relation mean-normalized adjacency A_r[i, j] = 1/deg_r(i) for each edge j->i of type r.
    counts = jnp.zeros((n_relations, num_nodes, num_nodes), jnp.float32)
    counts = counts.at[edge_type, dst, src].add(1.0)
    deg = counts.sum(axis=2, keepdims=True)
    a_rel = jnp.where(deg > 0, counts / jnp.maximum(deg, 1.0), 0.0)
    # GraphConv: plain sum adjacency (edge_weight = 1).
    a2 = jnp.zeros((num_nodes, num_nodes), jnp.float32).at[dst, src].add(1.0)
    return a_rel, a2


def graph_network_forward(x, edge_index, edge_norm, edge_type, seq_lengths, umask,
                          params, n_relations, compute_dtype=jnp.float32):
    # edge_norm / seq_lengths / umask are accepted for signature fidelity but unused
    # (exactly as in the PyTorch forward).
    del edge_norm, seq_lengths, umask
    n_nodes, in_feats = x.shape
    hid = params["w_root1"].shape[1]
    out_feats = params["w_smax"].shape[1]

    a_rel, a2 = build_dense_adjacency(edge_index, edge_type, n_nodes, n_relations)

    # Fold the per-relation RGCN messages into two matmuls:
    #   A_wide = [A_1 | ... | A_R]            shape [N, R*N]
    #   X_bd   = blockdiag(x, ..., x)         shape [R*N, R*Fin]
    #   A_wide @ X_bd = [A_1 x | ... | A_R x] shape [N, R*Fin]
    a_wide = jnp.transpose(a_rel, (1, 0, 2)).reshape(n_nodes, n_relations * n_nodes)
    x_bd = jnp.kron(jnp.eye(n_relations, dtype=jnp.float32), x.astype(jnp.float32))
    # TODO(synk): at large N build the block structure (or an edge-list gather) inside the kernel
    # instead of shipping O(R^2 * N * Fin) zeros through HBM.

    w_beta, b_beta, w_lin = params["w_beta"], params["b_beta"], params["w_lin"]
    # Lane-dense classifier head: zero-pad w_smax to 128 output lanes; pad b_smax with a large
    # negative so padded logits drop out of the in-kernel log_softmax.
    w_smax_pad = jnp.zeros((hid, LANE), jnp.float32).at[:, :out_feats].set(params["w_smax"])
    b_smax_pad = jnp.full((1, LANE), -1e30, jnp.float32).at[:, :out_feats].set(params["b_smax"])

    named_blocks = [
        ("w_rel_stack", params["w_rel"].reshape(n_relations * in_feats, hid)),
        ("w_root1", params["w_root1"]),
        ("w_rel2", params["w_rel2"]),
        ("w_root2", params["w_root2"]),
        ("wb_xx", w_beta[:in_feats, :in_feats]),
        ("wb_hx", w_beta[in_feats:, :in_feats]),
        ("wb_xh", w_beta[:in_feats, in_feats:]),
        ("wb_hh", w_beta[in_feats:, in_feats:]),
        ("wl_x", w_lin[:in_feats]),
        ("wl_h", w_lin[in_feats:]),
        ("w_smax", w_smax_pad),
        ("b1", params["b1"]),
        ("b_rel2", params["b_rel2"]),
        ("bb_x", b_beta[:, :in_feats]),
        ("bb_h", b_beta[:, in_feats:]),
        ("b_lin", params["b_lin"]),
        ("b_smax", b_smax_pad),
    ]
    slab, layout = _pack_weight_slab(named_blocks)

    cdt = compute_dtype
    inputs = [x.astype(cdt), a_wide.astype(cdt), x_bd.astype(cdt),
              a2.astype(cdt), slab.astype(cdt)]

    kernel = functools.partial(graph_network_kernel, layout=layout)
    out_padded = pl.pallas_call(
        kernel,
        out_shape=jax.ShapeDtypeStruct((n_nodes, LANE), jnp.float32),
        in_specs=[_full_spec(a.shape) for a in inputs],
        out_specs=_full_spec((n_nodes, LANE)),
    )(*inputs)
    return out_padded[:, :out_feats]


def reference_forward(x, a_rel, a2, p):
    """Plain-JAX reference of the same math (for sanity checking)."""
    h1 = x @ p["w_root1"] + p["b1"]
    h1 = h1 + jnp.einsum("rij,jf,rfh->ih", a_rel, x, p["w_rel"])
    h2 = (a2 @ h1) @ p["w_rel2"] + p["b_rel2"] + h1 @ p["w_root2"]
    hc = jnp.concatenate([x, h2], axis=-1)
    before = hc @ p["w_beta"] + p["b_beta"]
    late = before @ hc.T
    beta = jax.nn.softmax(late, axis=-1)
    em = beta @ hc
    hid = jax.nn.relu(em @ p["w_lin"] + p["b_lin"])
    logits = hid @ p["w_smax"] + p["b_smax"]
    return jax.nn.log_softmax(logits, axis=-1)


if __name__ == "__main__":
    # Small shapes consistent with the module.
    in_feats, out_feats, n_relations, graph_hid = 32, 6, 4, 64
    n_nodes, n_edges = 8, 24
    d_cat = in_feats + graph_hid

    key = jax.random.PRNGKey(0)
    ks = iter(jax.random.split(key, 24))

    x = jax.random.normal(next(ks), (n_nodes, in_feats), jnp.float32)
    src = jax.random.randint(next(ks), (n_edges,), 0, n_nodes)
    dst = jax.random.randint(next(ks), (n_edges,), 0, n_nodes)
    edge_index = jnp.stack([src, dst])                                  # [2, E]
    edge_type = jax.random.randint(next(ks), (n_edges,), 0, n_relations)
    edge_norm = jnp.ones((n_edges,), jnp.float32)                        # unused (as in PyTorch forward)
    seq_lengths = [4, 4]                                                 # unused
    umask = jnp.ones((n_nodes,), jnp.float32)                            # unused

    def init(k, shape, scale=0.1):
        return scale * jax.random.normal(k, shape, jnp.float32)

    num_bases = min(n_relations, 30)
    basis = init(next(ks), (num_bases, in_feats, graph_hid))
    comp = init(next(ks), (n_relations, num_bases))

    params = dict(
        w_rel=jnp.einsum("rb,bfh->rfh", comp, basis),       # RGCN basis decomposition
        w_root1=init(next(ks), (in_feats, graph_hid)),
        b1=init(next(ks), (1, graph_hid)),
        w_rel2=init(next(ks), (graph_hid, graph_hid)),
        b_rel2=init(next(ks), (1, graph_hid)),
        w_root2=init(next(ks), (graph_hid, graph_hid)),
        w_beta=init(next(ks), (d_cat, d_cat)),
        b_beta=init(next(ks), (1, d_cat)),
        w_lin=init(next(ks), (d_cat, graph_hid)),
        b_lin=init(next(ks), (1, graph_hid)),
        w_smax=init(next(ks), (graph_hid, out_feats)),
        b_smax=init(next(ks), (1, out_feats)),
    )

    # ---- f32 run: tight check against the plain-JAX reference ----
    out = graph_network_forward(x, edge_index, edge_norm, edge_type,
                                seq_lengths, umask, params, n_relations)
    out = jax.block_until_ready(out)
    assert out.shape == (n_nodes, out_feats)

    a_rel, a2 = build_dense_adjacency(edge_index, edge_type, n_nodes, n_relations)
    ref = jax.block_until_ready(reference_forward(x, a_rel, a2, params))
    np.testing.assert_allclose(np.asarray(out), np.asarray(ref), rtol=2e-4, atol=2e-4)

    # ---- bf16 run: MXU-native operands, f32 accumulation.  The sharpening softmax amplifies
    # bf16 rounding vs. the f32 reference, so assert structural properties instead of closeness.
    out_bf16 = graph_network_forward(x, edge_index, edge_norm, edge_type,
                                     seq_lengths, umask, params, n_relations,
                                     compute_dtype=jnp.bfloat16)
    out_bf16 = np.asarray(jax.block_until_ready(out_bf16))
    assert out_bf16.shape == (n_nodes, out_feats)
    assert np.all(np.isfinite(out_bf16))
    np.testing.assert_allclose(np.exp(out_bf16).sum(axis=1), 1.0, rtol=1e-3, atol=1e-3)

    print("KERNEL_OK")
</pallas_src>

<mosaic_0001>
module attributes {stable_mosaic.version = 11 : i64} {
  func.func @graph_network_kernel(%arg0: memref<8x32xf32, #tpu.memory_space<vmem>>, %arg1: memref<8x32xf32, #tpu.memory_space<vmem>>, %arg2: memref<32x128xf32, #tpu.memory_space<vmem>>, %arg3: memref<8x8xf32, #tpu.memory_space<vmem>>, %arg4: memref<688x128xf32, #tpu.memory_space<vmem>>, %arg5: memref<8x128xf32, #tpu.memory_space<vmem>>) attributes {dimension_semantics = [], scalar_prefetch = 0 : i64, scratch_operands = 0 : i64, tpu.core_type = #tpu.core_type<tc>} {
    %c0 = arith.constant 0 : index
    %c0_0 = arith.constant 0 : index
    %0 = vector.load %arg0[%c0, %c0_0] : memref<8x32xf32, #tpu.memory_space<vmem>>, vector<8x32xf32>
    %c0_1 = arith.constant 0 : index
    %c0_2 = arith.constant 0 : index
    %1 = vector.load %arg1[%c0_1, %c0_2] : memref<8x32xf32, #tpu.memory_space<vmem>>, vector<8x32xf32>
    %c0_3 = arith.constant 0 : index
    %c0_4 = arith.constant 0 : index
    %2 = vector.load %arg2[%c0_3, %c0_4] : memref<32x128xf32, #tpu.memory_space<vmem>>, vector<32x128xf32>
    %cst = arith.constant dense<0.000000e+00> : vector<8x128xf32>
    %3 = tpu.matmul %1, %2, %cst {dimension_numbers = #tpu.dot_dimension_numbers<[1], [0], [0], [1], [0, 0, 1, 1], [], []>} : vector<8x32xf32>, vector<32x128xf32>, vector<8x128xf32> -> vector<8x128xf32>
    %c128 = arith.constant 128 : index
    %c0_5 = arith.constant 0 : index
    %4 = vector.load %arg4[%c128, %c0_5] : memref<688x128xf32, #tpu.memory_space<vmem>>, vector<32x64xf32>
    %cst_6 = arith.constant dense<0.000000e+00> : vector<8x64xf32>
    %5 = tpu.matmul %0, %4, %cst_6 {dimension_numbers = #tpu.dot_dimension_numbers<[1], [0], [0], [1], [0, 0, 1, 1], [], []>} : vector<8x32xf32>, vector<32x64xf32>, vector<8x64xf32> -> vector<8x64xf32>
    %c0_7 = arith.constant 0 : index
    %c0_8 = arith.constant 0 : index
    %6 = vector.load %arg4[%c0_7, %c0_8] : memref<688x128xf32, #tpu.memory_space<vmem>>, vector<128x64xf32>
    %cst_9 = arith.constant dense<0.000000e+00> : vector<8x64xf32>
    %7 = tpu.matmul %3, %6, %cst_9 {dimension_numbers = #tpu.dot_dimension_numbers<[1], [0], [0], [1], [0, 0, 1, 1], [], []>} : vector<8x128xf32>, vector<128x64xf32>, vector<8x64xf32> -> vector<8x64xf32>
    %8 = arith.addf %5, %7 : vector<8x64xf32>
    %c640 = arith.constant 640 : index
    %c0_10 = arith.constant 0 : index
    %9 = vector.load %arg4[%c640, %c0_10] : memref<688x128xf32, #tpu.memory_space<vmem>>, vector<1x64xf32>
    %10 = vector.broadcast %9 : vector<1x64xf32> to vector<8x64xf32>
    %11 = arith.addf %8, %10 : vector<8x64xf32>
    %c0_11 = arith.constant 0 : index
    %c0_12 = arith.constant 0 : index
    %12 = vector.load %arg3[%c0_11, %c0_12] : memref<8x8xf32, #tpu.memory_space<vmem>>, vector<8x8xf32>
    %cst_13 = arith.constant dense<0.000000e+00> : vector<8x64xf32>
    %13 = tpu.matmul %12, %11, %cst_13 {dimension_numbers = #tpu.dot_dimension_numbers<[1], [0], [0], [1], [0, 0, 1, 1], [], []>} : vector<8x8xf32>, vector<8x64xf32>, vector<8x64xf32> -> vector<8x64xf32>
    %c160 = arith.constant 160 : index
    %c0_14 = arith.constant 0 : index
    %14 = vector.load %arg4[%c160, %c0_14] : memref<688x128xf32, #tpu.memory_space<vmem>>, vector<64x64xf32>
    %cst_15 = arith.constant dense<0.000000e+00> : vector<8x64xf32>
    %15 = tpu.matmul %13, %14, %cst_15 {dimension_numbers = #tpu.dot_dimension_numbers<[1], [0], [0], [1], [0, 0, 1, 1], [], []>} : vector<8x64xf32>, vector<64x64xf32>, vector<8x64xf32> -> vector<8x64xf32>
    %c648 = arith.constant 648 : index
    %c0_16 = arith.constant 0 : index
    %16 = vector.load %arg4[%c648, %c0_16] : memref<688x128xf32, #tpu.memory_space<vmem>>, vector<1x64xf32>
    %17 = vector.broadcast %16 : vector<1x64xf32> to vector<8x64xf32>
    %18 = arith.addf %15, %17 : vector<8x64xf32>
    %c224 = arith.constant 224 : index
    %c0_17 = arith.constant 0 : index
    %19 = vector.load %arg4[%c224, %c0_17] : memref<688x128xf32, #tpu.memory_space<vmem>>, vector<64x64xf32>
    %cst_18 = arith.constant dense<0.000000e+00> : vector<8x64xf32>
    %20 = tpu.matmul %11, %19, %cst_18 {dimension_numbers = #tpu.dot_dimension_numbers<[1], [0], [0], [1], [0, 0, 1, 1], [], []>} : vector<8x64xf32>, vector<64x64xf32>, vector<8x64xf32> -> vector<8x64xf32>
    %21 = arith.addf %18, %20 : vector<8x64xf32>
    %c288 = arith.constant 288 : index
    %c0_19 = arith.constant 0 : index
    %22 = vector.load %arg4[%c288, %c0_19] : memref<688x128xf32, #tpu.memory_space<vmem>>, vector<32x32xf32>
    %cst_20 = arith.constant dense<0.000000e+00> : vector<8x32xf32>
    %23 = tpu.matmul %0, %22, %cst_20 {dimension_numbers = #tpu.dot_dimension_numbers<[1], [0], [0], [1], [0, 0, 1, 1], [], []>} : vector<8x32xf32>, vector<32x32xf32>, vector<8x32xf32> -> vector<8x32xf32>
    %c320 = arith.constant 320 : index
    %c0_21 = arith.constant 0 : index
    %24 = vector.load %arg4[%c320, %c0_21] : memref<688x128xf32, #tpu.memory_space<vmem>>, vector<64x32xf32>
    %cst_22 = arith.constant dense<0.000000e+00> : vector<8x32xf32>
    %25 = tpu.matmul %21, %24, %cst_22 {dimension_numbers = #tpu.dot_dimension_numbers<[1], [0], [0], [1], [0, 0, 1, 1], [], []>} : vector<8x64xf32>, vector<64x32xf32>, vector<8x32xf32> -> vector<8x32xf32>
    %26 = arith.addf %23, %25 : vector<8x32xf32>
    %c656 = arith.constant 656 : index
    %c0_23 = arith.constant 0 : index
    %27 = vector.load %arg4[%c656, %c0_23] : memref<688x128xf32, #tpu.memory_space<vmem>>, vector<1x32xf32>
    %28 = vector.broadcast %27 : vector<1x32xf32> to vector<8x32xf32>
    %29 = arith.addf %26, %28 : vector<8x32xf32>
    %c384 = arith.constant 384 : index
    %c0_24 = arith.constant 0 : index
    %30 = vector.load %arg4[%c384, %c0_24] : memref<688x128xf32, #tpu.memory_space<vmem>>, vector<32x64xf32>
    %cst_25 = arith.constant dense<0.000000e+00> : vector<8x64xf32>
    %31 = tpu.matmul %0, %30, %cst_25 {dimension_numbers = #tpu.dot_dimension_numbers<[1], [0], [0], [1], [0, 0, 1, 1], [], []>} : vector<8x32xf32>, vector<32x64xf32>, vector<8x64xf32> -> vector<8x64xf32>
    %c416 = arith.constant 416 : index
    %c0_26 = arith.constant 0 : index
    %32 = vector.load %arg4[%c416, %c0_26] : memref<688x128xf32, #tpu.memory_space<vmem>>, vector<64x64xf32>
    %cst_27 = arith.constant dense<0.000000e+00> : vector<8x64xf32>
    %33 = tpu.matmul %21, %32, %cst_27 {dimension_numbers = #tpu.dot_dimension_numbers<[1], [0], [0], [1], [0, 0, 1, 1], [], []>} : vector<8x64xf32>, vector<64x64xf32>, vector<8x64xf32> -> vector<8x64xf32>
    %34 = arith.addf %31, %33 : vector<8x64xf32>
    %c664 = arith.constant 664 : index
    %c0_28 = arith.constant 0 : index
    %35 = vector.load %arg4[%c664, %c0_28] : memref<688x128xf32, #tpu.memory_space<vmem>>, vector<1x64xf32>
    %36 = vector.broadcast %35 : vector<1x64xf32> to vector<8x64xf32>
    %37 = arith.addf %34, %36 : vector<8x64xf32>
    %cst_29 = arith.constant dense<0.000000e+00> : vector<8x8xf32>
    %38 = tpu.matmul %29, %0, %cst_29 {dimension_numbers = #tpu.dot_dimension_numbers<[1], [1], [0], [0], [0, 0, 1, 0], [], []>} : vector<8x32xf32>, vector<8x32xf32>, vector<8x8xf32> -> vector<8x8xf32>
    %cst_30 = arith.constant dense<0.000000e+00> : vector<8x8xf32>
    %39 = tpu.matmul %37, %21, %cst_30 {dimension_numbers = #tpu.dot_dimension_numbers<[1], [1], [0], [0], [0, 0, 1, 0], [], []>} : vector<8x64xf32>, vector<8x64xf32>, vector<8x8xf32> -> vector<8x8xf32>
    %40 = arith.addf %38, %39 : vector<8x8xf32>
    %cst_31 = arith.constant dense<0xFF800000> : vector<8xf32>
    %41 = vector.multi_reduction <maximumf>, %40, %cst_31 [1] : vector<8x8xf32> to vector<8xf32>
    %cst_32 = arith.constant 0xFF800000 : f32
    %42 = vector.broadcast %cst_32 : f32 to vector<8xf32>
    %43 = arith.maximumf %42, %41 : vector<8xf32>
    %44 = vector.shape_cast %43 : vector<8xf32> to vector<8x1xf32>
    %45 = vector.broadcast %44 : vector<8x1xf32> to vector<8x8xf32>
    %46 = arith.subf %40, %45 : vector<8x8xf32>
    %47 = math.exp %46 : vector<8x8xf32>
    %cst_33 = arith.constant dense<0.000000e+00> : vector<8xf32>
    %48 = vector.multi_reduction <add>, %47, %cst_33 [1] : vector<8x8xf32> to vector<8xf32>
    %49 = vector.shape_cast %48 : vector<8xf32> to vector<8x1xf32>
    %50 = vector.broadcast %49 : vector<8x1xf32> to vector<8x8xf32>
    %51 = arith.divf %47, %50 : vector<8x8xf32>
    %cst_34 = arith.constant dense<0.000000e+00> : vector<8x32xf32>
    %52 = tpu.matmul %51, %0, %cst_34 {dimension_numbers = #tpu.dot_dimension_numbers<[1], [0], [0], [1], [0, 0, 1, 1], [], []>} : vector<8x8xf32>, vector<8x32xf32>, vector<8x32xf32> -> vector<8x32xf32>
    %cst_35 = arith.constant dense<0.000000e+00> : vector<8x64xf32>
    %53 = tpu.matmul %51, %21, %cst_35 {dimension_numbers = #tpu.dot_dimension_numbers<[1], [0], [0], [1], [0, 0, 1, 1], [], []>} : vector<8x8xf32>, vector<8x64xf32>, vector<8x64xf32> -> vector<8x64xf32>
    %c480 = arith.constant 480 : index
    %c0_36 = arith.constant 0 : index
    %54 = vector.load %arg4[%c480, %c0_36] : memref<688x128xf32, #tpu.memory_space<vmem>>, vector<32x64xf32>
    %cst_37 = arith.constant dense<0.000000e+00> : vector<8x64xf32>
    %55 = tpu.matmul %52, %54, %cst_37 {dimension_numbers = #tpu.dot_dimension_numbers<[1], [0], [0], [1], [0, 0, 1, 1], [], []>} : vector<8x32xf32>, vector<32x64xf32>, vector<8x64xf32> -> vector<8x64xf32>
    %c512 = arith.constant 512 : index
    %c0_38 = arith.constant 0 : index
    %56 = vector.load %arg4[%c512, %c0_38] : memref<688x128xf32, #tpu.memory_space<vmem>>, vector<64x64xf32>
    %cst_39 = arith.constant dense<0.000000e+00> : vector<8x64xf32>
    %57 = tpu.matmul %53, %56, %cst_39 {dimension_numbers = #tpu.dot_dimension_numbers<[1], [0], [0], [1], [0, 0, 1, 1], [], []>} : vector<8x64xf32>, vector<64x64xf32>, vector<8x64xf32> -> vector<8x64xf32>
    %58 = arith.addf %55, %57 : vector<8x64xf32>
    %c672 = arith.constant 672 : index
    %c0_40 = arith.constant 0 : index
    %59 = vector.load %arg4[%c672, %c0_40] : memref<688x128xf32, #tpu.memory_space<vmem>>, vector<1x64xf32>
    %60 = vector.broadcast %59 : vector<1x64xf32> to vector<8x64xf32>
    %61 = arith.addf %58, %60 : vector<8x64xf32>
    %cst_41 = arith.constant 0.000000e+00 : f32
    %62 = vector.broadcast %cst_41 : f32 to vector<8x64xf32>
    %63 = arith.maximumf %61, %62 : vector<8x64xf32>
    %c576 = arith.constant 576 : index
    %c0_42 = arith.constant 0 : index
    %64 = vector.load %arg4[%c576, %c0_42] : memref<688x128xf32, #tpu.memory_space<vmem>>, vector<64x128xf32>
    %cst_43 = arith.constant dense<0.000000e+00> : vector<8x128xf32>
    %65 = tpu.matmul %63, %64, %cst_43 {dimension_numbers = #tpu.dot_dimension_numbers<[1], [0], [0], [1], [0, 0, 1, 1], [], []>} : vector<8x64xf32>, vector<64x128xf32>, vector<8x128xf32> -> vector<8x128xf32>
    %c680 = arith.constant 680 : index
    %c0_44 = arith.constant 0 : index
    %66 = vector.load %arg4[%c680, %c0_44] : memref<688x128xf32, #tpu.memory_space<vmem>>, vector<1x128xf32>
    %67 = vector.broadcast %66 : vector<1x128xf32> to vector<8x128xf32>
    %68 = arith.addf %65, %67 : vector<8x128xf32>
    %cst_45 = arith.constant dense<0xFF800000> : vector<8xf32>
    %69 = vector.multi_reduction <maximumf>, %68, %cst_45 [1] : vector<8x128xf32> to vector<8xf32>
    %cst_46 = arith.constant 0xFF800000 : f32
    %70 = vector.broadcast %cst_46 : f32 to vector<8xf32>
    %71 = arith.maximumf %70, %69 : vector<8xf32>
    %72 = vector.shape_cast %71 : vector<8xf32> to vector<8x1xf32>
    %73 = vector.broadcast %72 : vector<8x1xf32> to vector<8x128xf32>
    %74 = arith.subf %68, %73 : vector<8x128xf32>
    %75 = math.exp %74 : vector<8x128xf32>
    %cst_47 = arith.constant dense<0.000000e+00> : vector<8xf32>
    %76 = vector.multi_reduction <add>, %75, %cst_47 [1] : vector<8x128xf32> to vector<8xf32>
    %77 = vector.shape_cast %76 : vector<8xf32> to vector<8x1xf32>
    %78 = math.log %77 : vector<8x1xf32>
    %79 = vector.broadcast %78 : vector<8x1xf32> to vector<8x128xf32>
    %80 = arith.subf %74, %79 : vector<8x128xf32>
    %c0_48 = arith.constant 0 : index
    %c0_49 = arith.constant 0 : index
    %81 = vector.load %arg5[%c0_48, %c0_49] : memref<8x128xf32, #tpu.memory_space<vmem>>, vector<8x128xf32>
    tpu.vector_store %arg5[%c0_48, %c0_49], %80 {strides = array<i32>} : memref<8x128xf32, #tpu.memory_space<vmem>>, vector<8x128xf32>,
    return
  }
}

</mosaic_0001>

<bundles_post_ra>
// kernel: tpu_custom_call.1
= control target key start
LH: loop header
LB: loop body
LE: loop exit
PB: predicated region body
PF: predicated region fallthrough
CT: control target
= control target key end

     0   :  { %10 = vsyncpa [#allocation3], 0  ;;  %s2310_s0 = inlined_call_operand.hbm [shape: f32[8,32], index: 0, kind: input, shape index: {}]   ;;  %s2311_s1 = inlined_call_operand.hbm [shape: f32[8,32], index: 1, kind: input, shape index: {}]   ;;  %s2312_s2 = inlined_call_operand.hbm [shape: f32[32,128], index: 2, kind: input, shape index: {}]   ;;  %s2313_s3 = inlined_call_operand.vmem [shape: f32[8,8], index: 3, kind: input, shape index: {}]   ;;  %s2314_s4 = inlined_call_operand.hbm [shape: f32[688,128], index: 4, kind: input, shape index: {}]   ;;  %s2315_s5 = inlined_call_operand.hbm [shape: f32[8,128], index: 5, kind: output, shape index: {}]  }
   0x1   :  { %11 = vsyncpa [#allocation6], 0 }
   0x2   :  { %12 = vsyncpa [#allocation9], 0 }
   0x3   :  { %13 = vsyncpa [#allocation4], 0  ;;  %s2089_s18 = smov [#allocation5]   ;;  %s2090_s20 = smov [#allocation2]  }
   0x4   :  { %s30_s19 = sshll.u32 %s2089_s18, 4  ;;  %s20_s21 = sshll.u32 %s2090_s20, 4  ;;  %s31_s19 = int_to_ptr.vmem [resolvable:$true] %s30_s19  ;;  %s21_s21 = int_to_ptr.vmem [resolvable:$true] %s20_s21 }
   0x5   :  { %s1971_s24 = scalar_lea.hbm %s2311_s1, 128 }
   0x6   :  { %p1972_p0 = scmp.ne.s32.totalorder %s2311_s1, %s1971_s24  ;;  %p1975_p1 = scmp.lt.u32.totalorder %s1971_s24, %s2311_s1 }
   0x8   :  { %p1977_p2 = pnand %p1975_p1, %p1972_p0 }
   0xa   :  { %1980 = shalt.err (!%p1977_p2)
}
   0xb   :  { %s1981_s29 = scalar_lea.vmem %s31_s19, 128  ;;  %p1986_p4 = scmp.lt.s32.totalorder %s31_s19, %s31_s19 }
   0xc   :  { %p1982_p3 = scmp.ne.s32.totalorder %s31_s19, %s1981_s29  ;;  %p1987_p5 = scmp.lt.s32.totalorder %s1981_s29, %s1981_s29 }
   0xe   :  { %p1988_p6 = por %p1987_p5, %p1986_p4 }
  0x10   :  { %p1989_p7 = pnand %p1988_p6, %p1982_p3 }
  0x12   :  { %1992 = shalt.err (!%p1989_p7)
}
  0x13   :  { %33 = dma.hbm_to_vmem [thread:$0]  %s2311_s1, 128, %s31_s19, [#allocation6]  }
  0x14   :  { %s1993_s9 = scalar_lea.hbm %s2310_s0, 128 }
  0x15   :  { %p1994_p8 = scmp.ne.s32.totalorder %s2310_s0, %s1993_s9  ;;  %p1997_p9 = scmp.lt.u32.totalorder %s1993_s9, %s2310_s0 }
  0x17   :  { %p1999_p10 = pnand %p1997_p9, %p1994_p8 }
  0x19   :  { %2002 = shalt.err (!%p1999_p10)
}
  0x1a   :  { %s2003_s14 = scalar_lea.vmem %s21_s21, 128  ;;  %p2008_p12 = scmp.lt.s32.totalorder %s21_s21, %s21_s21 }
  0x1b   :  { %p2004_p11 = scmp.ne.s32.totalorder %s21_s21, %s2003_s14  ;;  %p2009_p13 = scmp.lt.s32.totalorder %s2003_s14, %s2003_s14 }
  0x1d   :  { %p2010_p0 = por %p2009_p13, %p2008_p12 }
  0x1f   :  { %p2011_p1 = pnand %p2010_p0, %p2004_p11 }
  0x21   :  { %2014 = shalt.err (!%p2011_p1)
}
  0x22   :  { %23 = dma.hbm_to_vmem [thread:$0]  %s2310_s0, 128, %s21_s21, [#allocation3]  }
  0x23   :  { %s2091_s16 = smov [#allocation7]   ;;  %s2015_s20 = scalar_lea.hbm %s2312_s2, 512 }
  0x24   :  { %s39_s17 = sshll.u32 %s2091_s16, 4  ;;  %p2016_p2 = scmp.ne.s32.totalorder %s2312_s2, %s2015_s20  ;;  %s40_s17 = int_to_ptr.vmem [resolvable:$true] %s39_s17 }
  0x25   :  { %p2019_p3 = scmp.lt.u32.totalorder %s2015_s20, %s2312_s2 }
  0x27   :  { %p2021_p4 = pnand %p2019_p3, %p2016_p2 }
  0x29   :  { %2024 = shalt.err (!%p2021_p4)
}
  0x2a   :  { %s2025_s26 = scalar_lea.vmem %s40_s17, 512  ;;  %p2030_p6 = scmp.lt.s32.totalorder %s40_s17, %s40_s17 }
  0x2b   :  { %p2026_p5 = scmp.ne.s32.totalorder %s40_s17, %s2025_s26  ;;  %p2031_p7 = scmp.lt.s32.totalorder %s2025_s26, %s2025_s26 }
  0x2d   :  { %p2032_p8 = por %p2031_p7, %p2030_p6 }
  0x2f   :  { %p2033_p9 = pnand %p2032_p8, %p2026_p5 }
  0x31   :  { %2036 = shalt.err (!%p2033_p9)
}
  0x32   :  { %s2092_s0 = smov 128   ;;  %s2093_s21 = smov 8  }
  0x33   :  { %45 = dma.hbm_to_vmem [thread:$0]  %s2312_s2, 512, %s40_s17, [#allocation6], %s2092_s0, %s2092_s0, %s2093_s21  }
  0x34   :  { %s2094_s29 = smov [#allocation8]   ;;  %s2037_s8 = scalar_lea.hbm %s2314_s4, 11008 }
  0x35   :  { %s53_s30 = sshll.u32 %s2094_s29, 4  ;;  %p2038_p10 = scmp.ne.s32.totalorder %s2314_s4, %s2037_s8  ;;  %s54_s30 = int_to_ptr.vmem [resolvable:$true] %s53_s30 }
  0x36   :  { %p2041_p11 = scmp.lt.u32.totalorder %s2037_s8, %s2314_s4 }
  0x38   :  { %p2043_p12 = pnand %p2041_p11, %p2038_p10 }
  0x3a   :  { %2046 = shalt.err (!%p2043_p12)
}
  0x3b   :  { %s2047_s13 = scalar_lea.vmem %s54_s30, 11008  ;;  %p2052_p0 = scmp.lt.s32.totalorder %s54_s30, %s54_s30 }
  0x3c   :  { %p2048_p13 = scmp.ne.s32.totalorder %s54_s30, %s2047_s13  ;;  %p2053_p1 = scmp.lt.s32.totalorder %s2047_s13, %s2047_s13 }
  0x3e   :  { %p2054_p2 = por %p2053_p1, %p2052_p0 }
  0x40   :  { %p2055_p3 = pnand %p2054_p2, %p2048_p13 }
  0x42   :  { %2058 = shalt.err (!%p2055_p3)
}
  0x43   :  { %59 = dma.hbm_to_vmem [thread:$0]  %s2314_s4, 11008, %s54_s30, [#allocation9], %s2092_s0, %s2092_s0, %s2093_s21  }
  0x44   :  { %2081 = dma.done.wait [#allocation3], 128  }
  0x45   :  { %2082 = vsyncadd [#allocation3], 4294967168 }
  0x46   :  { %2083 = dma.done.wait [#allocation6], 640  }
  0x47   :  { %2084 = vsyncadd [#allocation6], 4294966656 }
  0x48   :  { %2085 = dma.done.wait [#allocation9], 11008  }
  0x49   :  { %2086 = vsyncadd [#allocation9], 4294956288  ;;  %v2095_v0 = vmov 0.0|0.0   ;;  %vm2096_vm0 = vmmov 0   ;;  %v2097_v1 = vmov 0.0   ;;  %v74_v2 = vld [vmem:[#allocation7] sm:$0xff] }
  0x4a   :  { %1822 = vmatprep.subr.bf16.mxu1 %v2095_v0  ;;  %1601 = vmatprep.mubr.msk.f32.mxu1 %vm2096_vm0, %v2097_v1  ;;  %v75_v3 = vld [vmem:[#allocation7 + $0x8] sm:$0xff]  ;;  %v76_v4 = vld [vmem:[#allocation7 + $0x10] sm:$0xff]  ;;  %v77_v6 = vld [vmem:[#allocation7 + $0x18] sm:$0xff]  ;;  %vm78_vm1 = vcmask 261120   ;;  %vm322_vm2 = vcmask 64512   ;;  %vm409_vm3 = vcmask 523264  }
  0x4b   :  { %1852 = vmatprep.subr.bf16.mxu0 %v2095_v0  ;;  %1647 = vmatprep.mubr.msk.f32.mxu0 %vm2096_vm0, %v2097_v1  ;;  %v1823_v5 = vpack.c.bf16 %v75_v3, %v74_v2  ;;  %v1826_v7 = vpack.c.bf16 %v77_v6, %v76_v4  ;;  %v156_v8 = vld [vmem:[#allocation8] sm:$0xff]  ;;  %v157_v9 = vld [vmem:[#allocation8 + $0x8] sm:$0xff]  ;;  %v73_v12 = vld [vmem:[#allocation5] sm:$0xff] }
  0x4c   :  { %v152_v10 = vld [vmem:[#allocation8 + $0x80] sm:$0xff]  ;;  %v153_v11 = vld [vmem:[#allocation8 + $0x88] sm:$0xff]  ;;  %v1829_v13 = vpack.c.bf16 %v157_v9, %v156_v8  ;;  %v154_v15 = vld [vmem:[#allocation8 + $0x90] sm:$0xff] }
  0x4d   :  { %1824 = vmatpush3.bf16.msra.mxu1 %v1823_v5  ;;  %v1853_v14 = vpack.c.bf16 %v153_v11, %v152_v10  ;;  %v155_v16 = vld [vmem:[#allocation8 + $0x98] sm:$0xff]  ;;  %v158_v17 = vld [vmem:[#allocation8 + $0x10] sm:$0xff]  ;;  %v160_v21 = vld [vmem:[#allocation8 + $0x20] sm:$0xff] }
  0x4e   :  { %1825 = vmatprep.subr.bf16.mxu1 %v2095_v0  ;;  %v159_v18 = vld [vmem:[#allocation8 + $0x18] sm:$0xff]  ;;  %v1856_v19 = vpack.c.bf16 %v155_v16, %v154_v15  ;;  %v161_v22 = vld [vmem:[#allocation8 + $0x28] sm:$0xff]  ;;  %v162_v24 = vld [vmem:[#allocation8 + $0x30] sm:$0xff] }
  0x4f   :  { %1854 = vmatpush3.bf16.msra.mxu0 %v1853_v14  ;;  %v1832_v20 = vpack.c.bf16 %v159_v18, %v158_v17  ;;  %v1835_v23 = vpack.c.bf16 %v161_v22, %v160_v21  ;;  %v163_v25 = vld [vmem:[#allocation8 + $0x38] sm:$0xff]  ;;  %v164_v27 = vld [vmem:[#allocation8 + $0x40] sm:$0xff]  ;;  %v165_v28 = vld [vmem:[#allocation8 + $0x48] sm:$0xff] }
  0x50   :  { %1855 = vmatprep.subr.bf16.mxu0 %v2095_v0  ;;  %v1838_v26 = vpack.c.bf16 %v163_v25, %v162_v24  ;;  %v1841_v29 = vpack.c.bf16 %v165_v28, %v164_v27  ;;  %v166_v30 = vld [vmem:[#allocation8 + $0x50] sm:$0xff]  ;;  %v167_v31 = vld [vmem:[#allocation8 + $0x58] sm:$0xff]  ;;  %v168_v33 = vld [vmem:[#allocation8 + $0x60] sm:$0xff] }
  0x51   :  { %1827 = vmatpush3.bf16.msra.mxu1 %v1826_v7  ;;  %v1844_v32 = vpack.c.bf16 %v167_v31, %v166_v30  ;;  %v169_v34 = vld [vmem:[#allocation8 + $0x68] sm:$0xff]  ;;  %v170_v36 = vld [vmem:[#allocation8 + $0x70] sm:$0xff]  ;;  %v171_v37 = vld [vmem:[#allocation8 + $0x78] sm:$0xff] }
  0x52   :  { %1828 = vmatprep.subr.bf16.mxu1 %v2095_v0  ;;  %v1847_v35 = vpack.c.bf16 %v169_v34, %v168_v33  ;;  %v1850_v38 = vpack.c.bf16 %v171_v37, %v170_v36  ;;  %v2198_v39 = vld [vmem:[#allocation2] sm:$0xff]  ;;  %v1465_v45 = vld [vmem:[#allocation8 + $0x280] ss:$0 sm:$0xff]  ;;  %v397_v47 = vld [vmem:[#allocation8 + $0xa8] sm:$0xff] }
  0x53   :  { %1857 = vmatpush3.bf16.msra.mxu0 %v1856_v19  ;;  %v396_v46 = vld [vmem:[#allocation8 + $0xa0] sm:$0xff]  ;;  %v321_v51 = vld [vmem:[%s2313_s3] sm:$0xff]  ;;  %v399_v54 = vld [vmem:[#allocation8 + $0xb8] sm:$0xff]  ;;  %s2098_s3 = smov [#allocation10]  }
  0x54   :  { %1602 = vmatmul.mubr.msk.f32.vlgmr.msra.gmra.mrb[0].mxu1 %vm78_vm1, %v73_v12  ;;  %1650 = vmatprep.subr.mxu0 %v2097_v1  ;;  %v1859_v52 = vpack.c.bf16 %v397_v47, %v396_v46  ;;  %v398_v53 = vld [vmem:[#allocation8 + $0xb0] sm:$0xff]  ;;  %v400_v56 = vld [vmem:[#allocation8 + $0xc0] sm:$0xff]  ;;  %v401_v57 = vld [vmem:[#allocation8 + $0xc8] sm:$0xff]  ;;  %s1452_s15 = sshll.u32 %s2098_s3, 4  ;;  %s1453_s15 = int_to_ptr.vmem [resolvable:$true] %s1452_s15 }
  0x55   :  { %1830 = vmatpush3.bf16.msra.mxu1 %v1829_v13  ;;  %1636 = vmatprep.mubr.msk.f32.mxu1 %vm2096_vm0, %v2097_v1  ;;  %v1862_v55 = vpack.c.bf16 %v399_v54, %v398_v53  ;;  %v1865_v58 = vpack.c.bf16 %v401_v57, %v400_v56  ;;  %v402_v59 = vld [vmem:[#allocation8 + $0xd0] sm:$0xff]  ;;  %v403_v60 = vld [vmem:[#allocation8 + $0xd8] sm:$0xff]  ;;  %v569_v62 = vld [vmem:[#allocation8 + $0x140] sm:$0xff]  ;;  %s2059_s16 = scalar_lea.vmem %s1453_s15, 128  ;;  %p2064_p5 = scmp.lt.s32.totalorder %s1453_s15, %s1453_s15 }
  0x56   :  { %1831 = vmatprep.subr.bf16.mxu1 %v2095_v0  ;;  %1648 = vmatmul.mubr.msk.f32.vlgmr.msra.gmra.mrb[0].mxu0 %vm78_vm1, %v2198_v39  ;;  %v1868_v61 = vpack.c.bf16 %v403_v60, %v402_v59  ;;  %v570_v63 = vld [vmem:[#allocation8 + $0x148] sm:$0xff]  ;;  %v571_v3 = vld [vmem:[#allocation8 + $0x150] sm:$0xff]  ;;  %v572_v4 = vld [vmem:[#allocation8 + $0x158] sm:$0xff]  ;;  %p2060_p4 = scmp.ne.s32.totalorder %s1453_s15, %s2059_s16  ;;  %p2065_p6 = scmp.lt.s32.totalorder %s2059_s16, %s2059_s16 }
  0x57   :  { %1652 = vmatprep.mubr.msk.f32.mxu0 %vm2096_vm0, %v2097_v1  ;;  %v1883_v2 = vpack.c.bf16 %v570_v63, %v569_v62  ;;  %v1886_v5 = vpack.c.bf16 %v572_v4, %v571_v3  ;;  %v573_v6 = vld [vmem:[#allocation8 + $0x160] sm:$0xff]  ;;  %v574_v7 = vld [vmem:[#allocation8 + $0x168] sm:$0xff]  ;;  %v575_v9 = vld [vmem:[#allocation8 + $0x170] sm:$0xff] }
  0x58   :  { %v1889_v8 = vpack.c.bf16 %v574_v7, %v573_v6  ;;  %v576_v10 = vld [vmem:[#allocation8 + $0x178] sm:$0xff]  ;;  %v483_v12 = vld [vmem:[#allocation8 + $0xe0] sm:$0xff]  ;;  %v484_v13 = vld [vmem:[#allocation8 + $0xe8] sm:$0xff]  ;;  %p2066_p7 = por %p2065_p6, %p2064_p5 }
  0x59   :  { %1833 = vmatpush3.bf16.msra.mxu1 %v1832_v20  ;;  %v1892_v11 = vpack.c.bf16 %v576_v10, %v575_v9  ;;  %v1871_v14 = vpack.c.bf16 %v484_v13, %v483_v12  ;;  %v485_v15 = vld [vmem:[#allocation8 + $0xf0] sm:$0xff]  ;;  %v486_v16 = vld [vmem:[#allocation8 + $0xf8] sm:$0xff]  ;;  %v487_v20 = vld [vmem:[#allocation8 + $0x100] sm:$0xff] }
  0x5a   :  { %1834 = vmatprep.subr.bf16.mxu1 %v2095_v0  ;;  %v1874_v19 = vpack.c.bf16 %v486_v16, %v485_v15  ;;  %v488_v21 = vld [vmem:[#allocation8 + $0x108] sm:$0xff]  ;;  %v490_v24 = vld [vmem:[#allocation8 + $0x118] sm:$0xff]  ;;  %v567_v46 = vld [vmem:[#allocation8 + $0x130] sm:$0xff]  ;;  %p2067_p8 = pnand %p2066_p7, %p2060_p4 }
  0x5b   :  { %v1877_v22 = vpack.c.bf16 %v488_v21, %v487_v20  ;;  %v731_v27 = vld [vmem:[#allocation8 + $0x1a8] sm:$0xff]  ;;  %v733_v30 = vld [vmem:[#allocation8 + $0x1b8] sm:$0xff]  ;;  %v1190_v16 = vld [vmem:[#allocation8 + $0x210] sm:$0xff] }
  0x5c   :  { %v735_v33 = vld [vmem:[#allocation8 + $0x1c8] sm:$0xff]  ;;  %v737_v36 = vld [vmem:[#allocation8 + $0x1d8] sm:$0xff]  ;;  %v1192_v20 = vld [vmem:[#allocation8 + $0x220] sm:$0xff] }
  0x5d   :  { %1836 = vmatpush3.bf16.msra.mxu1 %v1835_v23  ;;  %v489_v23 = vld [vmem:[#allocation8 + $0x110] sm:$0xff]  ;;  %v568_v47 = vld [vmem:[#allocation8 + $0x138] sm:$0xff]  ;;  %v1189_v15 = vld [vmem:[#allocation8 + $0x208] sm:$0xff] }
  0x5e   :  { %1837 = vmatprep.subr.bf16.mxu1 %v2095_v0  ;;  %v1880_v25 = vpack.c.bf16 %v490_v24, %v489_v23  ;;  %v729_v53 = vld [vmem:[#allocation8 + $0x198] sm:$0xff]  ;;  %v1193_v21 = vld [vmem:[#allocation8 + $0x228] sm:$0xff] }
  0x5f   :  { %v1475_v63 = vld [vmem:[#allocation8 + $0x298] ss:$0 sm:$0xff] }
  0x61   :  { %1839 = vmatpush3.bf16.msra.mxu1 %v1838_v26  ;;  %v730_v26 = vld [vmem:[#allocation8 + $0x1a0] sm:$0xff] }
  0x62   :  { %1840 = vmatprep.subr.bf16.mxu1 %v2095_v0  ;;  %v1901_v28 = vpack.c.bf16 %v731_v27, %v730_v26  ;;  %v1184_v26 = vld [vmem:[#allocation8 + $0x1e0] sm:$0xff]  ;;  %v1185_v27 = vld [vmem:[#allocation8 + $0x1e8] sm:$0xff] }
  0x65   :  { %1842 = vmatpush3.bf16.msra.mxu1 %v1841_v29  ;;  %v732_v29 = vld [vmem:[#allocation8 + $0x1b0] sm:$0xff] }
  0x66   :  { %1843 = vmatprep.subr.bf16.mxu1 %v2095_v0  ;;  %v1904_v31 = vpack.c.bf16 %v733_v30, %v732_v29  ;;  %v1186_v29 = vld [vmem:[#allocation8 + $0x1f0] sm:$0xff]  ;;  %v1187_v30 = vld [vmem:[#allocation8 + $0x1f8] sm:$0xff] }
  0x69   :  { %1845 = vmatpush3.bf16.msra.mxu1 %v1844_v32  ;;  %v734_v32 = vld [vmem:[#allocation8 + $0x1c0] sm:$0xff] }
  0x6a   :  { %1846 = vmatprep.subr.bf16.mxu1 %v2095_v0  ;;  %v1907_v34 = vpack.c.bf16 %v735_v33, %v734_v32  ;;  %v1194_v32 = vld [vmem:[#allocation8 + $0x230] sm:$0xff]  ;;  %v1195_v33 = vld [vmem:[#allocation8 + $0x238] sm:$0xff] }
  0x6d   :  { %1848 = vmatpush3.bf16.msra.mxu1 %v1847_v35  ;;  %v736_v35 = vld [vmem:[#allocation8 + $0x1d0] sm:$0xff] }
  0x6e   :  { %1849 = vmatprep.subr.bf16.mxu1 %v2095_v0  ;;  %v1910_v37 = vpack.c.bf16 %v737_v36, %v736_v35  ;;  %v1349_v35 = vld [vmem:[#allocation8 + $0x240] sm:$0xff]  ;;  %v1350_v36 = vld [vmem:[#allocation8 + $0x248] sm:$0xff] }
  0x71   :  { %1851 = vmatpush3.bf16.msra.mxu1 %v1850_v38  ;;  %v565_v38 = vld [vmem:[#allocation8 + $0x120] sm:$0xff] }
  0x72   :  { %1882 = vmatprep.subr.bf16.mxu1 %v2095_v0 }
 0x127   :  { %v148_v40 = vpop.f32.mrb[0].mxu1 }
 0x128   :  { %v1603_v41 = vpop.f32.mrb[1].mxu1  ;;  %1637 = vmatmul.mubr.f32.vlgmr.msra.gmra.mrb[2].mxu1 %v148_v40  ;;  %v566_v40 = vld [vmem:[#allocation8 + $0x128] sm:$0xff] }
 0x129   :  { %1709 = vmatprep.mubr.msk.f32.mxu1 %vm2096_vm0, %v2097_v1  ;;  %v311_v42 = vpop.f32.mrb[0].mxu0  ;;  %1884 = vmatpush3.bf16.msra.mxu1 %v1883_v2  ;;  %v1467_v41 = vld [vmem:[#allocation8 + $0x288] ss:$0 sm:$0xff] }
 0x12a   :  { %v1649_v43 = vpop.f32.mrb[1].mxu0  ;;  %1885 = vmatprep.subr.bf16.mxu1 %v2095_v0 }
 0x12b   :  { %v1895_v43 = vpack.c.bf16 %v566_v40, %v565_v38 }
 0x12d   :  { %1887 = vmatpush3.bf16.msra.mxu1 %v1886_v5  ;;  %v1472_v5 = vld [vmem:[#allocation8 + $0x290] ss:$0 sm:$0xff] }
 0x12e   :  { %1888 = vmatprep.subr.bf16.mxu1 %v2095_v0 }
 0x131   :  { %1890 = vmatpush3.bf16.msra.mxu1 %v1889_v8 }
 0x132   :  { %1891 = vmatprep.subr.bf16.mxu1 %v2095_v0 }
 0x135   :  { %1893 = vmatpush3.bf16.msra.mxu1 %v1892_v11 }
 0x136   :  { %1894 = vmatprep.subr.bf16.mxu1 %v2095_v0 }
 0x1fb   :  { %v238_v44 = vpop.f32.mrb[2].mxu1 }
 0x1fc   :  { %v312_v48 = vadd.f32 %v311_v42, %v238_v44  ;;  %v1638_v49 = vpop.f32.mrb[3].mxu1 }
 0x1fd   :  { %v726_v49 = vld [vmem:[#allocation8 + $0x180] sm:$0xff] }
 0x1fe   :  { %v2206_v50 = vadd.f32 %v1465_v45, %v312_v48  ;;  %v1898_v48 = vpack.c.bf16 %v568_v47, %v567_v46  ;;  %v1353_v46 = vld [vmem:[#allocation8 + $0x260] sm:$0xff]  ;;  %v1354_v47 = vld [vmem:[#allocation8 + $0x268] sm:$0xff] }
 0x200   :  { %1651 = vmatpush3.msra.mxu0 %v2206_v50 }
 0x201   :  { %1653 = vmatmul.mubr.msk.f32.vlgmr.msra.gmra.mrb[2].mxu0 %vm322_vm2, %v321_v51  ;;  %1858 = vmatprep.subr.bf16.mxu0 %v2095_v0 }
 0x202   :  { %1860 = vmatpush3.bf16.msra.mxu0 %v1859_v52  ;;  %1671 = vmatprep.mubr.msk.f32.mxu0 %vm2096_vm0, %v2097_v1  ;;  %v728_v52 = vld [vmem:[#allocation8 + $0x190] sm:$0xff] }
 0x203   :  { %1861 = vmatprep.subr.bf16.mxu0 %v2095_v0  ;;  %v1916_v54 = vpack.c.bf16 %v729_v53, %v728_v52 }
 0x206   :  { %1863 = vmatpush3.bf16.msra.mxu0 %v1862_v55 }
 0x207   :  { %1864 = vmatprep.subr.bf16.mxu0 %v2095_v0 }
 0x20a   :  { %1866 = vmatpush3.bf16.msra.mxu0 %v1865_v58 }
 0x20b   :  { %1867 = vmatprep.subr.bf16.mxu0 %v2095_v0 }
 0x20e   :  { %1869 = vmatpush3.bf16.msra.mxu0 %v1868_v61 }
 0x20f   :  { %1870 = vmatprep.subr.bf16.mxu0 %v2095_v0 }
 0x2d4   :  { %v392_v17 = vpop.f32.mrb[2].mxu0 }
 0x2d5   :  { %1672 = vmatmul.mubr.msk.f32.vlgmr.msra.gmra.mrb[4].mxu0 %vm409_vm3, %v392_v17  ;;  %v1654_v18 = vpop.f32.mrb[3].mxu0 }
 0x2d6   :  { %1872 = vmatpush3.bf16.msra.mxu0 %v1871_v14  ;;  %1690 = vmatprep.mubr.msk.f32.mxu0 %vm2096_vm0, %v2097_v1  ;;  %v1188_v14 = vld [vmem:[#allocation8 + $0x200] sm:$0xff]  ;;  %v1191_v18 = vld [vmem:[#allocation8 + $0x218] sm:$0xff] }
 0x2d7   :  { %1873 = vmatprep.subr.bf16.mxu0 %v2095_v0  ;;  %v1919_v17 = vpack.c.bf16 %v1189_v15, %v1188_v14 }
 0x2da   :  { %1875 = vmatpush3.bf16.msra.mxu0 %v1874_v19  ;;  %v1922_v19 = vpack.c.bf16 %v1191_v18, %v1190_v16 }
 0x2db   :  { %1876 = vmatprep.subr.bf16.mxu0 %v2095_v0 }
 0x2de   :  { %1878 = vmatpush3.bf16.msra.mxu0 %v1877_v22  ;;  %v1925_v22 = vpack.c.bf16 %v1193_v21, %v1192_v20 }
 0x2df   :  { %1879 = vmatprep.subr.bf16.mxu0 %v2095_v0 }
 0x2e2   :  { %1881 = vmatpush3.bf16.msra.mxu0 %v1880_v25 }
 0x2e3   :  { %1900 = vmatprep.subr.bf16.mxu0 %v2095_v0 }
 0x2e5   :  { %1691 = vmatmul.mubr.msk.f32.vlgmr.msra.gmra.mrb[4].mxu0 %vm409_vm3, %v2206_v50  ;;  %v727_v50 = vld [vmem:[#allocation8 + $0x188] sm:$0xff] }
 0x2e6   :  { %1902 = vmatpush3.bf16.msra.mxu0 %v1901_v28  ;;  %1739 = vmatprep.mubr.msk.f32.mxu0 %vm2096_vm0, %v2097_v1  ;;  %v1913_v51 = vpack.c.bf16 %v727_v50, %v726_v49  ;;  %v1931_v28 = vpack.c.bf16 %v1185_v27, %v1184_v26  ;;  %v1355_v49 = vld [vmem:[#allocation8 + $0x270] sm:$0xff] }
 0x2e7   :  { %1903 = vmatprep.subr.bf16.mxu0 %v2095_v0 }
 0x2ea   :  { %1905 = vmatpush3.bf16.msra.mxu0 %v1904_v31  ;;  %v1934_v31 = vpack.c.bf16 %v1187_v30, %v1186_v29 }
 0x2eb   :  { %1906 = vmatprep.subr.bf16.mxu0 %v2095_v0 }
 0x2ee   :  { %1908 = vmatpush3.bf16.msra.mxu0 %v1907_v34  ;;  %v1928_v34 = vpack.c.bf16 %v1195_v33, %v1194_v32 }
 0x2ef   :  { %1909 = vmatprep.subr.bf16.mxu0 %v2095_v0 }
 0x2f2   :  { %1911 = vmatpush3.bf16.msra.mxu0 %v1910_v37  ;;  %v1937_v37 = vpack.c.bf16 %v1350_v36, %v1349_v35 }
 0x2f3   :  { %1763 = vmatprep.subr.mxu0 %v2097_v1 }
 0x3b8   :  { %v560_v42 = vpop.f32.mrb[4].mxu0 }
 0x3b9   :  { %v2239_v44 = vadd.f32 %v1467_v41, %v560_v42  ;;  %v1692_v45 = vpop.f32.mrb[5].mxu0 }
 0x3bb   :  { %1710 = vmatmul.mubr.msk.f32.vlgmr.msra.gmra.mrb[4].mxu1 %vm409_vm3, %v2239_v44  ;;  %1740 = vmatmul.mubr.msk.f32.vlgmr.msra.gmra.mrb[6].mxu0 %vm409_vm3, %v2239_v44 }
 0x3bc   :  { %1896 = vmatpush3.bf16.msra.mxu1 %v1895_v43  ;;  %1720 = vmatprep.mubr.msk.f32.mxu1 %vm2096_vm0, %v2097_v1  ;;  %v1351_v43 = vld [vmem:[#allocation8 + $0x250] sm:$0xff] }
 0x3bd   :  { %1897 = vmatprep.subr.bf16.mxu1 %v2095_v0  ;;  %1764 = vmatpush3.msra.mxu0 %v2198_v39 }
 0x3be   :  { %1765 = vmatprep.mubr.msk.f32.mxu0 %vm2096_vm0, %v2097_v1  ;;  %1768 = vmatprep.subr.mxu0 %v2097_v1 }
 0x3c0   :  { %1899 = vmatpush3.bf16.msra.mxu1 %v1898_v48  ;;  %v1943_v48 = vpack.c.bf16 %v1354_v47, %v1353_v46 }
 0x3c1   :  { %1912 = vmatprep.subr.bf16.mxu1 %v2095_v0 }
 0x3c3   :  { %1721 = vmatmul.mubr.msk.f32.vlgmr.msra.gmra.mrb[6].mxu1 %vm78_vm1, %v2198_v39 }
 0x3c4   :  { %1914 = vmatpush3.bf16.msra.mxu1 %v1913_v51  ;;  %1750 = vmatprep.mubr.msk.f32.mxu1 %vm2096_vm0, %v2097_v1 }
 0x3c5   :  { %1915 = vmatprep.subr.bf16.mxu1 %v2095_v0 }
 0x3c8   :  { %1917 = vmatpush3.bf16.msra.mxu1 %v1916_v54  ;;  %v1484_v54 = vld [vmem:[#allocation8 + $0x2a0] ss:$0 sm:$0xff] }
 0x3c9   :  { %1753 = vmatprep.subr.mxu1 %v2097_v1 }
 0x3cb   :  { %1751 = vmatmul.mubr.msk.f32.vlgmr.msra.gmra.mrb[8].mxu1 %vm78_vm1, %v2198_v39 }
 0x3cc   :  { %1755 = vmatprep.mubr.msk.f32.mxu1 %vm2096_vm0, %v2097_v1 }
 0x3d1   :  { %1754 = vmatpush3.xpose.msk.msra.mxu1 %vm409_vm3, %v2239_v44 }
 0x3d2   :  { %1758 = vmatprep.subr.mxu1 %v2097_v1 }
 0x48e   :  { %v646_v55 = vpop.f32.mrb[4].mxu1  ;;  %v804_v56 = vpop.f32.mrb[6].mxu0 }
 0x48f   :  { %v1711_v57 = vpop.f32.mrb[5].mxu1  ;;  %v1741_v58 = vpop.f32.mrb[7].mxu0 }
 0x496   :  { %v716_v59 = vpop.f32.mrb[6].mxu1 }
 0x497   :  { %v717_v60 = vadd.f32 %v716_v59, %v646_v55  ;;  %v1722_v61 = vpop.f32.mrb[7].mxu1  ;;  %v1485_v59 = vld [vmem:[#allocation8 + $0x2a8] ss:$0 sm:$0xff] }
 0x499   :  { %v725_v6 = vadd.f32 %v1472_v5, %v717_v60 }
 0x49e   :  { %v874_v62 = vpop.f32.mrb[8].mxu1 }
 0x49f   :  { %v875_v2 = vadd.f32 %v874_v62, %v804_v56  ;;  %v1752_v3 = vpop.f32.mrb[9].mxu1 }
 0x4a1   :  { %v883_v4 = vadd.f32 %v1475_v63, %v875_v2 }
 0x4a3   :  { %1756 = vmatmul.mubr.msk.f32.vlgmr.msra.gmra.mrb[10].mxu1 %vm409_vm3, %v883_v4 }
 0x4a4   :  { %1759 = vmatpush3.xpose.msk.msra.mxu1 %vm78_vm1, %v2198_v39  ;;  %1760 = vmatprep.mubr.msk.f32.mxu1 %vm2096_vm0, %v2097_v1 }
 0x4a5   :  { %1918 = vmatprep.subr.bf16.mxu1 %v2095_v0 }
 0x4ab   :  { %1761 = vmatmul.mubr.msk.f32.vlgmr.msra.gmra.mrb[10].mxu1 %vm78_vm1, %v725_v6 }
 0x4ac   :  { %1789 = vmatprep.mubr.msk.f32.mxu1 %vm2096_vm0, %v2097_v1  ;;  %1920 = vmatpush3.bf16.msra.mxu1 %v1919_v17 }
 0x4ad   :  { %1921 = vmatprep.subr.bf16.mxu1 %v2095_v0 }
 0x4b0   :  { %1923 = vmatpush3.bf16.msra.mxu1 %v1922_v19 }
 0x4b1   :  { %1924 = vmatprep.subr.bf16.mxu1 %v2095_v0 }
 0x4b4   :  { %1926 = vmatpush3.bf16.msra.mxu1 %v1925_v22 }
 0x4b5   :  { %1927 = vmatprep.subr.bf16.mxu1 %v2095_v0 }
 0x4b8   :  { %1929 = vmatpush3.bf16.msra.mxu1 %v1928_v34 }
 0x57e   :  { %v1026_v7 = vpop.f32.mrb[10].mxu1 }
 0x57f   :  { %v1762_v8 = vpop.f32.mrb[11].mxu1  ;;  %v1030_v9 = vsel %vm322_vm2, %v1026_v7, -inf }
 0x580   :  { %1031 = vmax.xlane.f32.xlu0 %v1030_v9 }
 0x60d   :  { %v1032_v10 = vpop.xlane.xlu0 %1031 }
 0x60e   :  { %v1033_v11 = vsub.f32 %v1026_v7, %v1032_v10 }
 0x610   :  { %v1034_v39 = vmul.f32 1.442695, %v1033_v11 }
 0x612   :  { %1963 = vpow2.f32 %v1034_v39 }
 0x61c   :  { %v1964_v12 = vpop.eup %1963 }
 0x61d   :  { %v1036_v13 = vsel %vm322_vm2, %v1964_v12, 0.0 }
 0x61e   :  { %1037 = vadd.xlane.f32.xlu0 %v1036_v13 }
 0x6ab   :  { %v1038_v23 = vpop.xlane.xlu0 %1037 }
 0x6ac   :  { %1965 = vrcp.f32 %v1038_v23 }
 0x6b6   :  { %v1966_v24 = vpop.eup %1965 }
 0x6b7   :  { %v1040_v25 = vmul.f32 %v1966_v24, %v1964_v12 }
 0x6b9   :  { %1766 = vmatmul.mubr.msk.f32.vlgmr.msra.gmra.mrb[8].mxu0 %vm322_vm2, %v1040_v25 }
 0x6ba   :  { %1769 = vmatpush3.msra.mxu0 %v2239_v44  ;;  %1770 = vmatprep.mubr.msk.f32.mxu0 %vm2096_vm0, %v2097_v1  ;;  %v1352_v44 = vld [vmem:[#allocation8 + $0x258] sm:$0xff] }
 0x6bb   :  { %1930 = vmatprep.subr.bf16.mxu0 %v2095_v0  ;;  %v1940_v45 = vpack.c.bf16 %v1352_v44, %v1351_v43 }
 0x6bd   :  { %1771 = vmatmul.mubr.msk.f32.vlgmr.msra.gmra.mrb[10].mxu0 %vm322_vm2, %v1040_v25 }
 0x6be   :  { %1932 = vmatpush3.bf16.msra.mxu0 %v1931_v28  ;;  %1800 = vmatprep.mubr.msk.f32.mxu0 %vm2096_vm0, %v2097_v1 }
 0x6bf   :  { %1933 = vmatprep.subr.bf16.mxu0 %v2095_v0 }
 0x6c2   :  { %1935 = vmatpush3.bf16.msra.mxu0 %v1934_v31 }
 0x6c3   :  { %1936 = vmatprep.subr.bf16.mxu0 %v2095_v0 }
 0x78c   :  { %v1110_v38 = vpop.f32.mrb[8].mxu0 }
 0x78d   :  { %v1767_v40 = vpop.f32.mrb[9].mxu0  ;;  %1801 = vmatmul.mubr.msk.f32.vlgmr.msra.gmra.mrb[12].mxu0 %vm78_vm1, %v1110_v38 }
 0x78e   :  { %1938 = vmatpush3.bf16.msra.mxu0 %v1937_v37  ;;  %1819 = vmatprep.mubr.msk.f32.mxu0 %vm2096_vm0, %v2097_v1  ;;  %v1356_v1 = vld [vmem:[#allocation8 + $0x278] sm:$0xff] }
 0x78f   :  { %1939 = vmatprep.subr.bf16.mxu0 %v2095_v0  ;;  %v1946_v50 = vpack.c.bf16 %v1356_v1, %v1355_v49 }
 0x790   :  { %v1180_v41 = vpop.f32.mrb[10].mxu0 }
 0x791   :  { %v1772_v42 = vpop.f32.mrb[11].mxu0  ;;  %1790 = vmatmul.mubr.msk.f32.vlgmr.msra.gmra.mrb[12].mxu1 %vm409_vm3, %v1180_v41 }
 0x792   :  { %1941 = vmatpush3.bf16.msra.mxu0 %v1940_v45 }
 0x793   :  { %1942 = vmatprep.subr.bf16.mxu0 %v2095_v0 }
 0x796   :  { %1944 = vmatpush3.bf16.msra.mxu0 %v1943_v48 }
 0x797   :  { %1945 = vmatprep.subr.bf16.mxu0 %v2095_v0 }
 0x79a   :  { %1947 = vmatpush3.bf16.msra.mxu0 %v1946_v50 }
 0x860   :  { %v1338_v51 = vpop.f32.mrb[12].mxu0 }
 0x861   :  { %v1802_v52 = vpop.f32.mrb[13].mxu0 }
 0x864   :  { %v1265_v53 = vpop.f32.mrb[12].mxu1 }
 0x865   :  { %v1339_v55 = vadd.f32 %v1338_v51, %v1265_v53  ;;  %v1791_v56 = vpop.f32.mrb[13].mxu1 }
 0x867   :  { %v1347_v57 = vadd.f32 %v1484_v54, %v1339_v55 }
 0x869   :  { %v1348_v58 = vmax.f32 %v1347_v57, 0.0 }
 0x86b   :  { %1820 = vmatmul.mubr.msk.f32.vlgmr.msra.gmra.mrb[14].mxu0 %vm409_vm3, %v1348_v58 }
 0x93e   :  { %v1431_v60 = vpop.f32.mrb[14].mxu0 }
 0x93f   :  { %v1432_v61 = vadd.f32 %v1485_v59, %v1431_v60  ;;  %v1821_v62 = vpop.f32.mrb[15].mxu0 }
 0x941   :  { %1435 = vmax.xlane.f32.xlu1 %v1432_v61 }
 0x9ce   :  { %v1436_v0 = vpop.xlane.xlu1 %1435 }
 0x9cf   :  { %v1437_v63 = vsub.f32 %v1432_v61, %v1436_v0 }
 0x9d1   :  { %v1438_v2 = vmul.f32 1.442695, %v1437_v63 }
 0x9d3   :  { %1967 = vpow2.f32 %v1438_v2 }
 0x9dd   :  { %v1968_v3 = vpop.eup %1967 }
 0x9de   :  { %1440 = vadd.xlane.f32.xlu1 %v1968_v3 }
 0xa6b   :  { %v1441_v4 = vpop.xlane.xlu1 %1440 }
 0xa6c   :  { %1969 = vlog2.f32 %v1441_v4 }
 0xa76   :  { %v1970_v5 = vpop.eup %1969 }
 0xa77   :  { %v1443_v6 = vmul.f32 0.6931472, %v1970_v5 }
 0xa79   :  { %v1444_v7 = vsub.f32 %v1437_v63, %v1443_v6 }
 0xa7b   :  { %1445 = vst [vmem:[#allocation10] sm:$0xff] %v1444_v7 }
 0xa7c   :  { %2070 = shalt.err (!%p2067_p8)
}
 0xa7d   :  { %s2071_s19 = scalar_lea.hbm %s2315_s5, 128 }
 0xa7e   :  { %p2072_p9 = scmp.ne.s32.totalorder %s2315_s5, %s2071_s19  ;;  %p2075_p10 = scmp.lt.u32.totalorder %s2071_s19, %s2315_s5 }
 0xa80   :  { %p2077_p11 = pnand %p2075_p10, %p2072_p9 }
 0xa82   :  { %2080 = shalt.err (!%p2077_p11)
}
 0xa83   :  { %1455 = dma.vmem_to_hbm [thread:$0]  %s1453_s15, 128, %s2315_s5, [#allocation4]  }
 0xa84   :  { %2087 = dma.done.wait [#allocation4], 128  }
 0xa85   :  { %2088 = vsyncadd [#allocation4], 4294967168 }
 0xa86   :  { %1459 = vsyncpa [#allocation3], 1 }
 0xa87   :  { %1460 = vsyncpa [#allocation6], 1 }
 0xa88   :  { %1461 = vsyncpa [#allocation9], 1 }
 0xa89   :  { %1462 = vsyncpa [#allocation4], 1 }

</bundles_post_ra>
